<compile_context>
chip_gen: v7x
topology: tpu7x:2x2x1
jax: 0.10.0
libtpu: 0.0.40
codegen_flags: <defaults>
</compile_context>

<pallas_src>
import math

import jax
import jax.numpy as jnp
from jax.experimental import pallas as pl
from jax.experimental.pallas import tpu as pltpu


def _linear_kernel(x_ref, wt_ref, o_ref):
    """Single-pass matmul tile: o = x @ wt (full K carried inside the block)."""
    o_ref[...] = jnp.dot(
        x_ref[...], wt_ref[...], preferred_element_type=jnp.float32
    ).astype(o_ref.dtype)


def _tpu_params():
    """(vmem_capacity_bytes, num_tensorcores) with conservative fallbacks."""
    vmem_cap = 64 * 1024 * 1024  # conservative fallback: v7x per-TC VMEM size
    num_cores = 1                # conservative: single-block N is never wrong
    try:
        info = pltpu.get_tpu_info()
        cap = getattr(info, "vmem_capacity_bytes", None)
        if isinstance(cap, int) and cap > 0:
            vmem_cap = cap
        for name in ("num_tensorcores", "tensorcore_count", "num_cores",
                     "cores_per_chip", "core_count"):
            v = getattr(info, name, None)
            if isinstance(v, int) and v > 0:
                num_cores = v
                break
    except Exception:
        pass
    return vmem_cap, num_cores


def _choose_tiles(M, K, N, itemsize, budget, num_cores):
    """Pick (tm, tn); K is always carried in full per block."""

    def fits(tm_, tn_):
        # Pallas double-buffers each pipelined block.
        per_step = itemsize * (tm_ * K + K * tn_ + tm_ * tn_)
        return 2 * per_step <= budget

    # ---- tn: default is the full N (one unmasked lane-dense slab, no extra
    # grid steps).  Only split N when there really are >= 2 TensorCores and the
    # per-call work is big enough that halving the MXU phase beats paying the
    # ~600-cycle fixed per-grid-step overhead twice.
    tn = N
    big_enough = 2 * M * K * N >= 8 * 1024 * 1024  # ~8 MFLOP per call
    if num_cores >= 2 and big_enough:
        for cand in (2048, 1024, 512, 256, 128):
            if N % cand == 0 and N // cand >= 2:
                tn = cand
                break

    # Shrink tn if the chosen block overflows the VMEM budget even with a
    # minimal M tile (lane-dense 128-multiples remain legal block shapes).
    tm_min = min(M, 8)
    if not fits(tm_min, tn):
        for cand in (4096, 2048, 1024, 512, 256, 128):
            if fits(tm_min, cand):
                tn = cand
                break
        else:
            tn = 128  # last resort; see K-tiling TODO above

    # ---- tm: full M when it fits (x streamed exactly once); otherwise the
    # biggest MXU-friendly tile that fits the budget.  Overhang blocks are
    # write-masked by Pallas, so no divisibility assert is needed.
    if fits(M, tn):
        tm = M
    else:
        tm = 256
        for cand in (4096, 2048, 1024, 512, 256):
            if fits(cand, tn):
                tm = cand
                break
    return tm, tn


def fft_model_forward(x, wt, *, allow_xla_fallback=False):
    """Pallas equivalent of fft_model.forward.

    x  : (batch, fft_size)        float32
    wt : (fft_size, 2*fft_size)   float32 -- nn.Linear weight, pre-transposed
    returns (batch, 2*fft_size)   float32 == x @ W.T
    """
    M, K = x.shape
    K2, N = wt.shape
    assert K2 == K, "weight must be pre-transposed to (fft_size, 2*fft_size)"

    # Tiny-shape escape hatch: below ~one MXU pass of work, the pallas_call
    # custom-call boundary is pure overhead and blocks XLA fusion with
    # neighboring ops.  Disabled by default so the Pallas path is exercised.
    if allow_xla_fallback and 2 * M * K * N < (1 << 20):
        return x @ wt

    itemsize = jnp.dtype(x.dtype).itemsize
    vmem_cap, num_cores = _tpu_params()
    # Leave ~25% of physical VMEM as compiler/pipeline headroom; cap at 100 MiB
    # so v5e/v6e (128 MiB) don't over-commit.  ~48 MiB on v7x, ~96 MiB on v5e/v6e.
    vmem_limit = min(int(0.75 * vmem_cap), 100 * 1024 * 1024)
    budget = int(0.9 * vmem_limit)

    tm, tn = _choose_tiles(M, K, N, itemsize, budget, num_cores)
    n_n = pl.cdiv(N, tn)
    n_m = pl.cdiv(M, tm)

    # Grid order: N outer, M inner.  The weight block index depends only on the
    # outer axis, so each (K, tn) weight panel is DMA'd exactly once and stays
    # resident while the x tiles stream through the inner M axis.
    grid = (n_n, n_m)

    cost = pl.CostEstimate(
        flops=2 * M * N * K,
        transcendentals=0,
        bytes_accessed=itemsize * (n_n * M * K + K * N + M * N),
    )

    return pl.pallas_call(
        _linear_kernel,
        out_shape=jax.ShapeDtypeStruct((M, N), x.dtype),
        grid=grid,
        in_specs=[
            pl.BlockSpec((tm, K), lambda ni, mi: (mi, 0)),   # x tile
            pl.BlockSpec((K, tn), lambda ni, mi: (0, ni)),   # weight panel
        ],
        out_specs=pl.BlockSpec((tm, tn), lambda ni, mi: (mi, ni)),
        compiler_params=pltpu.CompilerParams(
            dimension_semantics=("parallel", "parallel"),
            vmem_limit_bytes=vmem_limit,
        ),
        cost_estimate=cost,
    )(x, wt)


if __name__ == "__main__":
    # Small shapes consistent with the module: fft_size=128, batch=8.
    fft_size = 128
    batch = 8

    key = jax.random.PRNGKey(0)
    kx, kw = jax.random.split(key)

    # Deterministic parameter init mimicking nn.Linear default:
    # uniform(-1/sqrt(in_features), 1/sqrt(in_features)).
    bound = 1.0 / math.sqrt(fft_size)
    w = jax.random.uniform(
        kw, (2 * fft_size, fft_size), dtype=jnp.float32, minval=-bound, maxval=bound
    )
    x = jax.random.normal(kx, (batch, fft_size), dtype=jnp.float32)

    # Transpose ONCE at "model init" (hoisted out of the forward path).
    wt = jnp.asarray(w.T)  # (fft_size, 2*fft_size)

    out = fft_model_forward(x, wt)  # Pallas path (fallback disabled)
    out = jax.block_until_ready(out)

    # Sanity check against plain-JAX reference (x @ W.T).
    ref = x @ w.T
    assert out.shape == (batch, 2 * fft_size)
    assert jnp.allclose(out, ref, atol=1e-4, rtol=1e-4)

    print("KERNEL_OK")
</pallas_src>

<mosaic_0001>
module attributes {stable_mosaic.version = 11 : i64} {
  func.func @_linear_kernel(%arg0: i32, %arg1: i32, %arg2: memref<8x128xf32, #tpu.memory_space<vmem>>, %arg3: memref<128x256xf32, #tpu.memory_space<vmem>>, %arg4: memref<8x256xf32, #tpu.memory_space<vmem>>) attributes {dimension_semantics = [#tpu.dimension_semantics<parallel>, #tpu.dimension_semantics<parallel>], iteration_bounds = array<i64: 1, 1>, scalar_prefetch = 0 : i64, scratch_operands = 0 : i64, tpu.core_type = #tpu.core_type<tc>, window_params = [{transform_indices = @transform_0, window_bounds = array<i64: 8, 128>}, {transform_indices = @transform_1, window_bounds = array<i64: 128, 256>}, {transform_indices = @transform_2, window_bounds = array<i64: 8, 256>}]} {
    %c0 = arith.constant 0 : index
    %c0_0 = arith.constant 0 : index
    %0 = vector.load %arg2[%c0, %c0_0] : memref<8x128xf32, #tpu.memory_space<vmem>>, vector<8x128xf32>
    %c0_1 = arith.constant 0 : index
    %c0_2 = arith.constant 0 : index
    %1 = vector.load %arg3[%c0_1, %c0_2] : memref<128x256xf32, #tpu.memory_space<vmem>>, vector<128x256xf32>
    %cst = arith.constant dense<0.000000e+00> : vector<8x256xf32>
    %2 = tpu.matmul %0, %1, %cst {dimension_numbers = #tpu.dot_dimension_numbers<[1], [0], [0], [1], [0, 0, 1, 1], [], []>} : vector<8x128xf32>, vector<128x256xf32>, vector<8x256xf32> -> vector<8x256xf32>
    %c0_3 = arith.constant 0 : index
    %c0_4 = arith.constant 0 : index
    %3 = vector.load %arg4[%c0_3, %c0_4] : memref<8x256xf32, #tpu.memory_space<vmem>>, vector<8x256xf32>
    tpu.vector_store %arg4[%c0_3, %c0_4], %2 {strides = array<i32>} : memref<8x256xf32, #tpu.memory_space<vmem>>, vector<8x256xf32>,
    return
  }
  func.func @transform_0(%arg0: i32, %arg1: i32) -> (i32, i32) {
    %c0_i32 = arith.constant 0 : i32
    %c0_i32_0 = arith.constant 0 : i32
    return %arg1, %c0_i32 : i32, i32
  }
  func.func @transform_1(%arg0: i32, %arg1: i32) -> (i32, i32) {
    %c0_i32 = arith.constant 0 : i32
    %c0_i32_0 = arith.constant 0 : i32
    return %c0_i32, %arg0 : i32, i32
  }
  func.func @transform_2(%arg0: i32, %arg1: i32) -> (i32, i32) {
    %c0_i32 = arith.constant 0 : i32
    return %arg1, %arg0 : i32, i32
  }
}

</mosaic_0001>

<bundles_post_ra>
// kernel: tpu_custom_call.1
= control target key start
LH: loop header
LB: loop body
LE: loop exit
PB: predicated region body
PF: predicated region fallthrough
CT: control target
= control target key end

     0   :  { %7 = vsyncpa [#allocation3], 0  ;;  %s334_s0 = inlined_call_operand.hbm [shape: f32[8,128], index: 0, kind: input, shape index: {}]   ;;  %s335_s1 = inlined_call_operand.hbm [shape: f32[128,256], index: 1, kind: input, shape index: {}]   ;;  %s336_s2 = inlined_call_operand.hbm [shape: f32[8,256], index: 2, kind: output, shape index: {}]  }
   0x1   :  { %8 = vsyncpa [#allocation6], 0 }
   0x2   :  { %9 = vsyncpa [#allocation4], 0  ;;  %s270_s9 = smov [#allocation2]   ;;  %s271_s11 = smov [#allocation5]  }
   0x3   :  { %s16_s10 = sshll.u32 %s270_s9, 4  ;;  %s25_s12 = sshll.u32 %s271_s11, 4  ;;  %s17_s10 = int_to_ptr.vmem [resolvable:$true] %s16_s10  ;;  %s291_s12 = int_to_ptr.vmem [resolvable:$true] %s25_s12 }
   0x4   :  { %s198_s15 = scalar_lea.hbm %s334_s0, 128 }
   0x5   :  { %p199_p0 = scmp.ne.s32.totalorder %s334_s0, %s198_s15  ;;  %p202_p1 = scmp.lt.u32.totalorder %s198_s15, %s334_s0 }
   0x7   :  { %p204_p2 = pnand %p202_p1, %p199_p0 }
   0x9   :  { %207 = shalt.err (!%p204_p2)
}
   0xa   :  { %s208_s20 = scalar_lea.vmem %s17_s10, 128  ;;  %p213_p4 = scmp.lt.s32.totalorder %s17_s10, %s17_s10 }
   0xb   :  { %p209_p3 = scmp.ne.s32.totalorder %s17_s10, %s208_s20  ;;  %p214_p5 = scmp.lt.s32.totalorder %s208_s20, %s208_s20 }
   0xd   :  { %p215_p6 = por %p214_p5, %p213_p4 }
   0xf   :  { %p216_p7 = pnand %p215_p6, %p209_p3 }
  0x11   :  { %219 = shalt.err (!%p216_p7)
}
  0x12   :  { %19 = dma.hbm_to_vmem [thread:$0]  %s334_s0, 128, %s17_s10, [#allocation3]  }
  0x13   :  { %s220_s25 = scalar_lea.hbm %s335_s1, 4096 }
  0x14   :  { %p221_p8 = scmp.ne.s32.totalorder %s335_s1, %s220_s25  ;;  %p224_p9 = scmp.lt.u32.totalorder %s220_s25, %s335_s1 }
  0x16   :  { %p226_p10 = pnand %p224_p9, %p221_p8 }
  0x18   :  { %229 = shalt.err (!%p226_p10)
}
  0x19   :  { %s230_s30 = scalar_lea.vmem %s291_s12, 4096  ;;  %p235_p12 = scmp.lt.s32.totalorder %s291_s12, %s291_s12 }
  0x1a   :  { %p231_p11 = scmp.ne.s32.totalorder %s291_s12, %s230_s30  ;;  %p236_p13 = scmp.lt.s32.totalorder %s230_s30, %s230_s30 }
  0x1c   :  { %p237_p0 = por %p236_p13, %p235_p12 }
  0x1e   :  { %p238_p1 = pnand %p237_p0, %p231_p11 }
  0x20   :  { %241 = shalt.err (!%p238_p1)
}
  0x21   :  { %s272_s0 = smov 256   ;;  %s273_s3 = smov 16  }
  0x22   :  { %31 = dma.hbm_to_vmem [thread:$0]  %s335_s1, 4096, %s291_s12, [#allocation6], %s272_s0, %s272_s0, %s273_s3  }
  0x23   :  { %264 = dma.done.wait [#allocation3], 128  }
  0x24   :  { %265 = vsyncadd [#allocation3], 4294967168 }
  0x25   :  { %266 = dma.done.wait [#allocation6], 4096  }
  0x26   :  { %267 = vsyncadd [#allocation6], 4294963200  ;;  %v274_v0 = vmov 0.0   ;;  %v40_v1 = vld [vmem:[#allocation5 + $0x8] sm:$0xff]  ;;  %v42_v2 = vld [vmem:[#allocation5 + $0x18] sm:$0xff]  ;;  %s275_s1 = smov [#allocation7]  }
  0x27   :  { %135 = vmatprep.mubr.f32.mxu0 %v274_v0  ;;  %v39_v3 = vld [vmem:[#allocation5] sm:$0xff]  ;;  %v160_v4 = vpack.c.bf16 %v42_v2, %v40_v1  ;;  %v41_v5 = vld [vmem:[#allocation5 + $0x10] sm:$0xff]  ;;  %v44_v6 = vld [vmem:[#allocation5 + $0x28] sm:$0xff]  ;;  %s150_s6 = sshll.u32 %s275_s1, 4  ;;  %s151_s6 = int_to_ptr.vmem [resolvable:$true] %s150_s6 }
  0x28   :  { %v46_v7 = vld [vmem:[#allocation5 + $0x38] sm:$0xff]  ;;  %v162_v8 = vpack.c.bf16 %v41_v5, %v39_v3  ;;  %v43_v10 = vld [vmem:[#allocation5 + $0x20] sm:$0xff]  ;;  %v45_v11 = vld [vmem:[#allocation5 + $0x30] sm:$0xff]  ;;  %s242_s7 = scalar_lea.vmem %s151_s6, 256  ;;  %p247_p3 = scmp.lt.s32.totalorder %s151_s6, %s151_s6 }
  0x29   :  { %v164_v9 = vpack.c.bf16 %v46_v7, %v44_v6  ;;  %v48_v12 = vld [vmem:[#allocation5 + $0x48] sm:$0xff]  ;;  %161 = vmatprep.subr.bf16.mxu0 %v160_v4  ;;  %v50_v13 = vld [vmem:[#allocation5 + $0x58] sm:$0xff]  ;;  %v166_v14 = vpack.c.bf16 %v45_v11, %v43_v10  ;;  %v47_v16 = vld [vmem:[#allocation5 + $0x40] sm:$0xff]  ;;  %p243_p2 = scmp.ne.s32.totalorder %s151_s6, %s242_s7  ;;  %p248_p4 = scmp.lt.s32.totalorder %s242_s7, %s242_s7 }
  0x2a   :  { %163 = vmatpush1.bf16.msra.mxu0 %v162_v8  ;;  %v168_v15 = vpack.c.bf16 %v50_v13, %v48_v12  ;;  %v49_v17 = vld [vmem:[#allocation5 + $0x50] sm:$0xff]  ;;  %v52_v18 = vld [vmem:[#allocation5 + $0x68] sm:$0xff]  ;;  %v54_v19 = vld [vmem:[#allocation5 + $0x78] sm:$0xff] }
  0x2b   :  { %165 = vmatprep.subr.bf16.mxu0 %v164_v9  ;;  %v170_v20 = vpack.c.bf16 %v49_v17, %v47_v16  ;;  %v172_v21 = vpack.c.bf16 %v54_v19, %v52_v18  ;;  %v51_v22 = vld [vmem:[#allocation5 + $0x60] sm:$0xff]  ;;  %v53_v23 = vld [vmem:[#allocation5 + $0x70] sm:$0xff]  ;;  %v56_v24 = vld [vmem:[#allocation5 + $0x88] sm:$0xff]  ;;  %p249_p5 = por %p248_p4, %p247_p3 }
  0x2c   :  { %v58_v25 = vld [vmem:[#allocation5 + $0x98] sm:$0xff]  ;;  %v174_v26 = vpack.c.bf16 %v53_v23, %v51_v22  ;;  %v55_v28 = vld [vmem:[#allocation5 + $0x80] sm:$0xff]  ;;  %v57_v29 = vld [vmem:[#allocation5 + $0x90] sm:$0xff] }
  0x2d   :  { %v176_v27 = vpack.c.bf16 %v58_v25, %v56_v24  ;;  %v60_v30 = vld [vmem:[#allocation5 + $0xa8] sm:$0xff]  ;;  %v62_v31 = vld [vmem:[#allocation5 + $0xb8] sm:$0xff]  ;;  %v178_v32 = vpack.c.bf16 %v57_v29, %v55_v28  ;;  %v59_v34 = vld [vmem:[#allocation5 + $0xa0] sm:$0xff]  ;;  %p250_p6 = pnand %p249_p5, %p243_p2 }
  0x2e   :  { %167 = vmatpush1.bf16.msra.mxu0 %v166_v14  ;;  %v180_v33 = vpack.c.bf16 %v62_v31, %v60_v30  ;;  %v61_v35 = vld [vmem:[#allocation5 + $0xb0] sm:$0xff]  ;;  %v64_v36 = vld [vmem:[#allocation5 + $0xc8] sm:$0xff]  ;;  %v66_v37 = vld [vmem:[#allocation5 + $0xd8] sm:$0xff] }
  0x2f   :  { %169 = vmatprep.subr.bf16.mxu0 %v168_v15  ;;  %v182_v38 = vpack.c.bf16 %v61_v35, %v59_v34  ;;  %v184_v39 = vpack.c.bf16 %v66_v37, %v64_v36  ;;  %v63_v40 = vld [vmem:[#allocation5 + $0xc0] sm:$0xff]  ;;  %v65_v41 = vld [vmem:[#allocation5 + $0xd0] sm:$0xff]  ;;  %v68_v42 = vld [vmem:[#allocation5 + $0xe8] sm:$0xff] }
  0x30   :  { %v70_v43 = vld [vmem:[#allocation5 + $0xf8] sm:$0xff]  ;;  %v186_v44 = vpack.c.bf16 %v65_v41, %v63_v40  ;;  %v67_v46 = vld [vmem:[#allocation5 + $0xe0] sm:$0xff]  ;;  %v69_v47 = vld [vmem:[#allocation5 + $0xf0] sm:$0xff] }
  0x31   :  { %v188_v45 = vpack.c.bf16 %v70_v43, %v68_v42  ;;  %v190_v48 = vpack.c.bf16 %v69_v47, %v67_v46  ;;  %v38_v49 = vld [vmem:[#allocation2] sm:$0xff] }
  0x32   :  { %171 = vmatpush1.bf16.msra.mxu0 %v170_v20 }
  0x33   :  { %173 = vmatprep.subr.bf16.mxu0 %v172_v21 }
  0x36   :  { %175 = vmatpush1.bf16.msra.mxu0 %v174_v26 }
  0x37   :  { %177 = vmatprep.subr.bf16.mxu0 %v176_v27 }
  0x3a   :  { %179 = vmatpush1.bf16.msra.mxu0 %v178_v32 }
  0x3b   :  { %181 = vmatprep.subr.bf16.mxu0 %v180_v33 }
  0x3e   :  { %183 = vmatpush1.bf16.msra.mxu0 %v182_v38 }
  0x3f   :  { %185 = vmatprep.subr.bf16.mxu0 %v184_v39 }
  0x42   :  { %187 = vmatpush1.bf16.msra.mxu0 %v186_v44 }
  0x43   :  { %189 = vmatprep.subr.bf16.mxu0 %v188_v45 }
  0x46   :  { %191 = vmatpush1.bf16.msra.mxu0 %v190_v48 }
  0x49   :  { %136 = vmatmul.mubr.f32.vlgmr.msra.gmra.mrb[0].mxu0 %v38_v49 }
 0x11c   :  { %v137_v50 = vpop.f32.mrb[0].mxu0 }
 0x11d   :  { %142 = vst [vmem:[#allocation7] sm:$0xff] %v137_v50  ;;  %v139_v51 = vpop.f32.mrb[1].mxu0 }
 0x11e   :  { %143 = vst [vmem:[#allocation7 + $0x8] sm:$0xff] %v139_v51 }
 0x11f   :  { %253 = shalt.err (!%p250_p6)
}
 0x120   :  { %s254_s10 = scalar_lea.hbm %s336_s2, 256 }
 0x121   :  { %p255_p7 = scmp.ne.s32.totalorder %s336_s2, %s254_s10  ;;  %p258_p8 = scmp.lt.u32.totalorder %s254_s10, %s336_s2 }
 0x123   :  { %p260_p9 = pnand %p258_p8, %p255_p7 }
 0x125   :  { %263 = shalt.err (!%p260_p9)
}
 0x126   :  { %153 = dma.vmem_to_hbm [thread:$0]  %s151_s6, 256, %s336_s2, [#allocation4]  }
 0x127   :  { %268 = dma.done.wait [#allocation4], 256  }
 0x128   :  { %269 = vsyncadd [#allocation4], 4294967040 }
 0x129   :  { %157 = vsyncpa [#allocation3], 1 }
 0x12a   :  { %158 = vsyncpa [#allocation6], 1 }
 0x12b   :  { %159 = vsyncpa [#allocation4], 1 }

</bundles_post_ra>
